<compile_context>
chip_gen: v5e
topology: v5e:2x2
jax: 0.10.0
libtpu: 0.0.40
codegen_flags: <defaults>
</compile_context>

<pallas_src>
import functools

import jax
import jax.numpy as jnp
from jax import lax
from jax.experimental import pallas as pl
from jax.experimental.pallas import tpu as pltpu


def gap_fc_kernel(x_ref, wt_ref, seg_ref, b_ref, o_ref, acc_ref, *,
                  n_lane_chunks, hi_precision):
    # x_ref:   (ROW_TILE, TILE_HW)  rows = flattened (batch, channel) pairs
    # wt_ref:  (ROW_TILE, OUT)      = (W^T / HW) tiled b_tile times (resident)
    # seg_ref: (B_TILE, ROW_TILE)   0/1 segment-sum matrix (resident)
    # b_ref:   (1, OUT)             bias (resident)
    # o_ref:   (B_TILE, OUT)        output block (resident across the HW axis)
    # acc_ref: (ROW_TILE, 128) f32  lane-parallel partial-sum accumulator
    j = pl.program_id(1)

    @pl.when(j == 0)
    def _init():
        acc_ref[...] = jnp.zeros_like(acc_ref)

    # Partial global-average-pool: accumulate 128-lane chunks of the current
    # spatial tile with plain VPU adds.  The cross-lane (XLU) reduce happens
    # only once, in the finalize, so the hot loop stays purely DMA-bound.
    if n_lane_chunks <= 16:
        partial = x_ref[:, 0:128].astype(jnp.float32)
        for k in range(1, n_lane_chunks):
            partial = partial + x_ref[:, k * 128:(k + 1) * 128].astype(jnp.float32)
    else:
        def body(k, p):
            off = pl.multiple_of(k * 128, 128)
            return p + x_ref[:, pl.ds(off, 128)].astype(jnp.float32)
        partial = lax.fori_loop(1, n_lane_chunks, body,
                                x_ref[:, 0:128].astype(jnp.float32))
    acc_ref[...] += partial

    @pl.when(j == pl.num_programs(1) - 1)
    def _finalize():
        # Single cross-lane reduce over the 128 partial lanes.
        pooled = jnp.sum(acc_ref[...], axis=-1, keepdims=True)     # (ROW_TILE, 1)
        # wt already carries the 1/(H*W) scale -> full FC term per row.
        contrib = pooled * wt_ref[...]                              # (ROW_TILE, OUT)
        # Segment-sum over the C rows of each batch sample -> (B_TILE, OUT).
        if hi_precision:
            y = jnp.dot(seg_ref[...], contrib,
                        preferred_element_type=jnp.float32,
                        precision=lax.Precision.HIGHEST)
        else:
            y = jnp.dot(seg_ref[...], contrib,
                        preferred_element_type=jnp.float32)
        o_ref[...] = (y + b_ref[...]).astype(o_ref.dtype)


def _sublane_multiple(dtype):
    """Dtype-aware sublane packing multiple (f32:8, bf16:16, int8/fp8:32)."""
    return {4: 8, 2: 16, 1: 32}.get(jnp.dtype(dtype).itemsize, 8)


def _vmem_capacity_bytes():
    try:
        return int(pltpu.get_tpu_info().vmem_capacity_bytes)
    except Exception:
        return 64 * 1024 * 1024   # conservative (v7x-sized) fallback


def _pick_b_tile(B, C, sublane):
    """Smallest legal batch tile.  Small b_tile maximizes the 'parallel' row
    axis (keeps both v7x TensorCores fed) and leaves VMEM for the x tile."""
    for bt in range(1, B + 1):
        if B % bt:
            continue
        rows_ok = ((bt * C) % sublane == 0) or (bt == B)
        out_ok = (bt % sublane == 0) or (bt == B)
        if rows_ok and out_ok:
            return bt
    return B


def _pick_hw_tile(hw_pad, row_tile, itemsize, x_budget_bytes):
    """Largest multiple-of-128 divisor of (padded) HW whose double-buffered
    streamed tile fits the budget.  hw_pad is always a multiple of 128."""
    best = 128
    t = 128
    while t <= hw_pad:
        if hw_pad % t == 0 and 2 * row_tile * t * itemsize <= x_budget_bytes:
            best = t
        t += 128
    return best


def gap_block_forward(x_nchw, weight, bias, *, b_tile=None, tile_hw=None):
    """GAPBlock forward.  x_nchw: (B, C, H, W); weight: (out_ch, C); bias: (out_ch,)."""
    B, C, H, W = x_nchw.shape
    out_ch, c_in = weight.shape
    assert c_in == C
    HW = H * W
    itemsize = jnp.dtype(x_nchw.dtype).itemsize

    # ---- tiling -------------------------------------------------------------
    if b_tile is None:
        b_tile = _pick_b_tile(B, C, _sublane_multiple(x_nchw.dtype))
    row_tile = b_tile * C

    # Zero-pad the spatial axis to a multiple of 128 (exact: kernel only sums,
    # mean scale below uses the true HW).
    hw_pad = ((HW + 127) // 128) * 128

    vmem_cap = _vmem_capacity_bytes()
    # Budget for the double-buffered x stream: ~3/8 of VMEM, capped at 48 MiB
    # (=> ~24 MiB on v7x's 64 MiB, ~48 MiB on v5e/v6e's 128 MiB).
    x_budget = min(vmem_cap * 3 // 8, 48 * 1024 * 1024)
    if tile_hw is None:
        tile_hw = _pick_hw_tile(hw_pad, row_tile, itemsize, x_budget)
    assert B % b_tile == 0 and hw_pad % tile_hw == 0 and tile_hw % 128 == 0

    # ---- glue reshapes / parameter prep (plain JAX, outside the hot loop) ---
    x_flat = x_nchw.reshape(B * C, HW)                       # (B*C, HW)
    if hw_pad != HW:
        x_flat = jnp.pad(x_flat, ((0, 0), (0, hw_pad - HW)))
    wt_scaled = weight.T.astype(jnp.float32) / float(HW)     # fold mean scale
    wt_tiled = jnp.tile(wt_scaled, (b_tile, 1))              # (row_tile, out_ch)
    # seg[b, r] = 1 iff flattened row r belongs to local batch sample b.
    seg = (jnp.arange(row_tile) // C ==
           jnp.arange(b_tile)[:, None]).astype(jnp.float32)  # (b_tile, row_tile)
    b_2d = bias.reshape(1, out_ch).astype(jnp.float32)

    grid = (B // b_tile, hw_pad // tile_hw)
    n_lane_chunks = tile_hw // 128

    param_bytes = 4 * (wt_tiled.size + seg.size + b_2d.size + B * out_ch)
    needed = (2 * row_tile * tile_hw * itemsize   # double-buffered x stream
              + 2 * param_bytes                   # params (worst case 2x)
              + row_tile * 128 * 4                # accumulator scratch
              + (2 << 20))                        # slack
    vmem_limit = int(min(vmem_cap * 3 // 4, max(needed, 32 * 1024 * 1024)))

    cost = pl.CostEstimate(
        flops=int(B * C * hw_pad + 2 * B * row_tile * out_ch),
        transcendentals=0,
        bytes_accessed=int(x_flat.size * itemsize + param_bytes),
    )

    def _call(params_buffered, hi_precision):
        def _const_spec(shape):
            if params_buffered:
                return pl.BlockSpec(shape, lambda i, j: (0, 0),
                                    pipeline_mode=pl.Buffered(1))
            return pl.BlockSpec(shape, lambda i, j: (0, 0))

        kernel = functools.partial(gap_fc_kernel,
                                   n_lane_chunks=n_lane_chunks,
                                   hi_precision=hi_precision)
        return pl.pallas_call(
            kernel,
            out_shape=jax.ShapeDtypeStruct((B, out_ch), x_nchw.dtype),
            grid_spec=pltpu.PrefetchScalarGridSpec(
                num_scalar_prefetch=0,
                grid=grid,
                in_specs=[
                    # Streamed input: tiled over rows and the spatial axis.
                    pl.BlockSpec((row_tile, tile_hw), lambda i, j: (i, j)),
                    # Resident parameters (constant block index).
                    _const_spec((row_tile, out_ch)),
                    _const_spec((b_tile, row_tile)),
                    _const_spec((1, out_ch)),
                ],
                # Output block constant along the HW (reduction) axis:
                # written only in the pl.when finalize.
                out_specs=pl.BlockSpec((b_tile, out_ch), lambda i, j: (i, 0)),
                scratch_shapes=[pltpu.VMEM((row_tile, 128), jnp.float32)],
            ),
            compiler_params=pltpu.CompilerParams(
                dimension_semantics=("parallel", "arbitrary"),
                vmem_limit_bytes=vmem_limit,
            ),
            cost_estimate=cost,
        )(x_flat, wt_tiled, seg, b_2d)

    # Prefer single-buffered resident params + HIGHEST-precision finalize dot;
    # fall back to the plain (known-good) configuration if this JAX/Mosaic
    # build rejects either knob at spec-construction / lowering time.
    try:
        return _call(params_buffered=True, hi_precision=True)
    except Exception:
        return _call(params_buffered=False, hi_precision=False)


def reference_forward(x_nchw, weight, bias):
    pooled = jnp.mean(x_nchw, axis=(2, 3))                   # (B, C)
    return pooled @ weight.T + bias


if __name__ == "__main__":
    key = jax.random.PRNGKey(0)
    k_x, k_w, k_b = jax.random.split(key, 3)

    B, hidden_ch, H, W = 2, 4, 16, 16
    out_ch = 8

    x = jax.random.normal(k_x, (B, hidden_ch, H, W), dtype=jnp.float32)
    # Deterministic synthetic parameters (nn.Linear(hidden_ch, out_ch) shapes).
    weight = jax.random.normal(k_w, (out_ch, hidden_ch), dtype=jnp.float32) * 0.1
    bias = jax.random.normal(k_b, (out_ch,), dtype=jnp.float32) * 0.1

    # tile_hw=128 forces 2 reduction steps so the accumulate/finalize pipeline
    # is actually exercised at this toy spatial size.
    y = gap_block_forward(x, weight, bias, tile_hw=128)
    y = jax.block_until_ready(y)
    y_ref = reference_forward(x, weight, bias)
    assert y.shape == (B, out_ch)
    assert jnp.allclose(y, y_ref, atol=1e-5, rtol=1e-5), (
        f"max abs err {jnp.max(jnp.abs(y - y_ref))}")

    # Second check: a non-128-divisible spatial extent exercises the
    # zero-padding path and the automatic tile selection.
    x2 = jax.random.normal(k_x, (B, hidden_ch, 15, 15), dtype=jnp.float32)
    y2 = jax.block_until_ready(gap_block_forward(x2, weight, bias))
    y2_ref = reference_forward(x2, weight, bias)
    assert jnp.allclose(y2, y2_ref, atol=1e-5, rtol=1e-5), (
        f"max abs err {jnp.max(jnp.abs(y2 - y2_ref))}")

    print("KERNEL_OK")
</pallas_src>

<mosaic_0001>
module attributes {stable_mosaic.version = 11 : i64} {
  func.func @gap_fc_kernel(%arg0: i32, %arg1: i32, %arg2: memref<8x128xf32, #tpu.memory_space<vmem>>, %arg3: memref<8x8xf32, #tpu.memory_space<vmem>>, %arg4: memref<2x8xf32, #tpu.memory_space<vmem>>, %arg5: memref<1x8xf32, #tpu.memory_space<vmem>>, %arg6: memref<2x8xf32, #tpu.memory_space<vmem>>, %arg7: memref<8x128xf32, #tpu.memory_space<vmem>>) attributes {dimension_semantics = [#tpu.dimension_semantics<parallel>, #tpu.dimension_semantics<arbitrary>], iteration_bounds = array<i64: 1, 2>, scalar_prefetch = 0 : i64, scratch_operands = 1 : i64, tpu.core_type = #tpu.core_type<tc>, window_params = [{transform_indices = @transform_0, window_bounds = array<i64: 8, 128>}, {pipeline_mode = #tpu.pipeline_mode<synchronous>, transform_indices = @transform_1, window_bounds = array<i64: 8, 8>}, {pipeline_mode = #tpu.pipeline_mode<synchronous>, transform_indices = @transform_2, window_bounds = array<i64: 2, 8>}, {pipeline_mode = #tpu.pipeline_mode<synchronous>, transform_indices = @transform_3, window_bounds = array<i64: 1, 8>}, {transform_indices = @transform_4, window_bounds = array<i64: 2, 8>}]} {
    %c0_i32 = arith.constant 0 : i32
    %0 = arith.cmpi eq, %arg1, %c0_i32 : i32
    %1 = arith.extui %0 : i1 to i32
    %c0_i32_0 = arith.constant 0 : i32
    %2 = arith.cmpi ne, %1, %c0_i32_0 : i32
    scf.if %2 {
      %cst = arith.constant 0.000000e+00 : f32
      %10 = vector.broadcast %cst : f32 to vector<8x128xf32>
      %c0_7 = arith.constant 0 : index
      %c0_8 = arith.constant 0 : index
      %11 = vector.load %arg7[%c0_7, %c0_8] : memref<8x128xf32, #tpu.memory_space<vmem>>, vector<8x128xf32>
      tpu.vector_store %arg7[%c0_7, %c0_8], %10 {strides = array<i32>} : memref<8x128xf32, #tpu.memory_space<vmem>>, vector<8x128xf32>,
    } else {
    }
    %c0 = arith.constant 0 : index
    %c0_1 = arith.constant 0 : index
    %3 = vector.load %arg2[%c0, %c0_1] : memref<8x128xf32, #tpu.memory_space<vmem>>, vector<8x128xf32>
    %c0_2 = arith.constant 0 : index
    %c0_3 = arith.constant 0 : index
    %4 = vector.load %arg7[%c0_2, %c0_3] : memref<8x128xf32, #tpu.memory_space<vmem>>, vector<8x128xf32>
    %5 = arith.addf %4, %3 : vector<8x128xf32>
    %c0_4 = arith.constant 0 : index
    %c0_5 = arith.constant 0 : index
    %6 = vector.load %arg7[%c0_4, %c0_5] : memref<8x128xf32, #tpu.memory_space<vmem>>, vector<8x128xf32>
    tpu.vector_store %arg7[%c0_4, %c0_5], %5 {strides = array<i32>} : memref<8x128xf32, #tpu.memory_space<vmem>>, vector<8x128xf32>,
    %c1_i32 = arith.constant 1 : i32
    %7 = arith.cmpi eq, %arg1, %c1_i32 : i32
    %8 = arith.extui %7 : i1 to i32
    %c0_i32_6 = arith.constant 0 : i32
    %9 = arith.cmpi ne, %8, %c0_i32_6 : i32
    scf.if %9 {
      %c0_7 = arith.constant 0 : index
      %c0_8 = arith.constant 0 : index
      %10 = vector.load %arg7[%c0_7, %c0_8] : memref<8x128xf32, #tpu.memory_space<vmem>>, vector<8x128xf32>
      %cst = arith.constant dense<0.000000e+00> : vector<8xf32>
      %11 = vector.multi_reduction <add>, %10, %cst [1] : vector<8x128xf32> to vector<8xf32>
      %12 = vector.shape_cast %11 : vector<8xf32> to vector<8x1xf32>
      %c0_9 = arith.constant 0 : index
      %c0_10 = arith.constant 0 : index
      %13 = vector.load %arg3[%c0_9, %c0_10] : memref<8x8xf32, #tpu.memory_space<vmem>>, vector<8x8xf32>
      %14 = vector.broadcast %12 : vector<8x1xf32> to vector<8x8xf32>
      %15 = arith.mulf %14, %13 : vector<8x8xf32>
      %c0_11 = arith.constant 0 : index
      %c0_12 = arith.constant 0 : index
      %16 = vector.load %arg4[%c0_11, %c0_12] : memref<2x8xf32, #tpu.memory_space<vmem>>, vector<2x8xf32>
      %cst_13 = arith.constant dense<0.000000e+00> : vector<2x8xf32>
      %17 = tpu.matmul %16, %15, %cst_13 {dimension_numbers = #tpu.dot_dimension_numbers<[1], [0], [0], [1], [0, 0, 1, 1], [], []>, precision = #tpu.contract_precision<fp32>} : vector<2x8xf32>, vector<8x8xf32>, vector<2x8xf32> -> vector<2x8xf32>
      %c0_14 = arith.constant 0 : index
      %c0_15 = arith.constant 0 : index
      %18 = vector.load %arg5[%c0_14, %c0_15] : memref<1x8xf32, #tpu.memory_space<vmem>>, vector<1x8xf32>
      %19 = vector.broadcast %18 : vector<1x8xf32> to vector<2x8xf32>
      %20 = arith.addf %17, %19 : vector<2x8xf32>
      %c0_16 = arith.constant 0 : index
      %c0_17 = arith.constant 0 : index
      %21 = vector.load %arg6[%c0_16, %c0_17] : memref<2x8xf32, #tpu.memory_space<vmem>>, vector<2x8xf32>
      tpu.vector_store %arg6[%c0_16, %c0_17], %20 {strides = array<i32>} : memref<2x8xf32, #tpu.memory_space<vmem>>, vector<2x8xf32>,
    } else {
    }
    return
  }
  func.func @transform_0(%arg0: i32, %arg1: i32) -> (i32, i32) {
    %c0_i32 = arith.constant 0 : i32
    return %arg0, %arg1 : i32, i32
  }
  func.func @transform_1(%arg0: i32, %arg1: i32) -> (i32, i32) {
    %c0_i32 = arith.constant 0 : i32
    %c0_i32_0 = arith.constant 0 : i32
    %c0_i32_1 = arith.constant 0 : i32
    return %c0_i32, %c0_i32_0 : i32, i32
  }
  func.func @transform_2(%arg0: i32, %arg1: i32) -> (i32, i32) {
    %c0_i32 = arith.constant 0 : i32
    %c0_i32_0 = arith.constant 0 : i32
    %c0_i32_1 = arith.constant 0 : i32
    return %c0_i32, %c0_i32_0 : i32, i32
  }
  func.func @transform_3(%arg0: i32, %arg1: i32) -> (i32, i32) {
    %c0_i32 = arith.constant 0 : i32
    %c0_i32_0 = arith.constant 0 : i32
    %c0_i32_1 = arith.constant 0 : i32
    return %c0_i32, %c0_i32_0 : i32, i32
  }
  func.func @transform_4(%arg0: i32, %arg1: i32) -> (i32, i32) {
    %c0_i32 = arith.constant 0 : i32
    %c0_i32_0 = arith.constant 0 : i32
    return %arg0, %c0_i32 : i32, i32
  }
}

module attributes {stable_mosaic.version = 11 : i64} {
  func.func @gap_fc_kernel(%arg0: i32, %arg1: i32, %arg2: memref<8x128xf32, #tpu.memory_space<vmem>>, %arg3: memref<8x8xf32, #tpu.memory_space<vmem>>, %arg4: memref<2x8xf32, #tpu.memory_space<vmem>>, %arg5: memref<1x8xf32, #tpu.memory_space<vmem>>, %arg6: memref<2x8xf32, #tpu.memory_space<vmem>>, %arg7: memref<8x128xf32, #tpu.memory_space<vmem>>) attributes {dimension_semantics = [#tpu.dimension_semantics<parallel>, #tpu.dimension_semantics<arbitrary>], iteration_bounds = array<i64: 1, 2>, scalar_prefetch = 0 : i64, scratch_operands = 1 : i64, tpu.core_type = #tpu.core_type<tc>, window_params = [{transform_indices = @transform_0, window_bounds = array<i64: 8, 128>}, {pipeline_mode = #tpu.pipeline_mode<synchronous>, transform_indices = @transform_1, window_bounds = array<i64: 8, 8>}, {pipeline_mode = #tpu.pipeline_mode<synchronous>, transform_indices = @transform_2, window_bounds = array<i64: 2, 8>}, {pipeline_mode = #tpu.pipeline_mode<synchronous>, transform_indices = @transform_3, window_bounds = array<i64: 1, 8>}, {transform_indices = @transform_4, window_bounds = array<i64: 2, 8>}]} {
    %c0_i32 = arith.constant 0 : i32
    %0 = arith.cmpi eq, %arg1, %c0_i32 : i32
    %1 = arith.extui %0 : i1 to i32
    %c0_i32_0 = arith.constant 0 : i32
    %2 = arith.cmpi ne, %1, %c0_i32_0 : i32
    scf.if %2 {
      %cst = arith.constant 0.000000e+00 : f32
      %10 = vector.broadcast %cst : f32 to vector<8x128xf32>
      %c0_7 = arith.constant 0 : index
      %c0_8 = arith.constant 0 : index
      %11 = vector.load %arg7[%c0_7, %c0_8] : memref<8x128xf32, #tpu.memory_space<vmem>>, vector<8x128xf32>
      tpu.vector_store %arg7[%c0_7, %c0_8], %10 {strides = array<i32>} : memref<8x128xf32, #tpu.memory_space<vmem>>, vector<8x128xf32>,
    } else {
    }
    %c0 = arith.constant 0 : index
    %c0_1 = arith.constant 0 : index
    %3 = vector.load %arg2[%c0, %c0_1] : memref<8x128xf32, #tpu.memory_space<vmem>>, vector<8x128xf32>
    %c0_2 = arith.constant 0 : index
    %c0_3 = arith.constant 0 : index
    %4 = vector.load %arg7[%c0_2, %c0_3] : memref<8x128xf32, #tpu.memory_space<vmem>>, vector<8x128xf32>
    %5 = arith.addf %4, %3 : vector<8x128xf32>
    %c0_4 = arith.constant 0 : index
    %c0_5 = arith.constant 0 : index
    %6 = vector.load %arg7[%c0_4, %c0_5] : memref<8x128xf32, #tpu.memory_space<vmem>>, vector<8x128xf32>
    tpu.vector_store %arg7[%c0_4, %c0_5], %5 {strides = array<i32>} : memref<8x128xf32, #tpu.memory_space<vmem>>, vector<8x128xf32>,
    %c1_i32 = arith.constant 1 : i32
    %7 = arith.cmpi eq, %arg1, %c1_i32 : i32
    %8 = arith.extui %7 : i1 to i32
    %c0_i32_6 = arith.constant 0 : i32
    %9 = arith.cmpi ne, %8, %c0_i32_6 : i32
    scf.if %9 {
      %c0_7 = arith.constant 0 : index
      %c0_8 = arith.constant 0 : index
      %10 = vector.load %arg7[%c0_7, %c0_8] : memref<8x128xf32, #tpu.memory_space<vmem>>, vector<8x128xf32>
      %cst = arith.constant dense<0.000000e+00> : vector<8xf32>
      %11 = vector.multi_reduction <add>, %10, %cst [1] : vector<8x128xf32> to vector<8xf32>
      %12 = vector.shape_cast %11 : vector<8xf32> to vector<8x1xf32>
      %c0_9 = arith.constant 0 : index
      %c0_10 = arith.constant 0 : index
      %13 = vector.load %arg3[%c0_9, %c0_10] : memref<8x8xf32, #tpu.memory_space<vmem>>, vector<8x8xf32>
      %14 = vector.broadcast %12 : vector<8x1xf32> to vector<8x8xf32>
      %15 = arith.mulf %14, %13 : vector<8x8xf32>
      %c0_11 = arith.constant 0 : index
      %c0_12 = arith.constant 0 : index
      %16 = vector.load %arg4[%c0_11, %c0_12] : memref<2x8xf32, #tpu.memory_space<vmem>>, vector<2x8xf32>
      %cst_13 = arith.constant dense<0.000000e+00> : vector<2x8xf32>
      %17 = tpu.matmul %16, %15, %cst_13 {dimension_numbers = #tpu.dot_dimension_numbers<[1], [0], [0], [1], [0, 0, 1, 1], [], []>} : vector<2x8xf32>, vector<8x8xf32>, vector<2x8xf32> -> vector<2x8xf32>
      %c0_14 = arith.constant 0 : index
      %c0_15 = arith.constant 0 : index
      %18 = vector.load %arg5[%c0_14, %c0_15] : memref<1x8xf32, #tpu.memory_space<vmem>>, vector<1x8xf32>
      %19 = vector.broadcast %18 : vector<1x8xf32> to vector<2x8xf32>
      %20 = arith.addf %17, %19 : vector<2x8xf32>
      %c0_16 = arith.constant 0 : index
      %c0_17 = arith.constant 0 : index
      %21 = vector.load %arg6[%c0_16, %c0_17] : memref<2x8xf32, #tpu.memory_space<vmem>>, vector<2x8xf32>
      tpu.vector_store %arg6[%c0_16, %c0_17], %20 {strides = array<i32>} : memref<2x8xf32, #tpu.memory_space<vmem>>, vector<2x8xf32>,
    } else {
    }
    return
  }
  func.func @transform_0(%arg0: i32, %arg1: i32) -> (i32, i32) {
    %c0_i32 = arith.constant 0 : i32
    return %arg0, %arg1 : i32, i32
  }
  func.func @transform_1(%arg0: i32, %arg1: i32) -> (i32, i32) {
    %c0_i32 = arith.constant 0 : i32
    %c0_i32_0 = arith.constant 0 : i32
    %c0_i32_1 = arith.constant 0 : i32
    return %c0_i32, %c0_i32_0 : i32, i32
  }
  func.func @transform_2(%arg0: i32, %arg1: i32) -> (i32, i32) {
    %c0_i32 = arith.constant 0 : i32
    %c0_i32_0 = arith.constant 0 : i32
    %c0_i32_1 = arith.constant 0 : i32
    return %c0_i32, %c0_i32_0 : i32, i32
  }
  func.func @transform_3(%arg0: i32, %arg1: i32) -> (i32, i32) {
    %c0_i32 = arith.constant 0 : i32
    %c0_i32_0 = arith.constant 0 : i32
    %c0_i32_1 = arith.constant 0 : i32
    return %c0_i32, %c0_i32_0 : i32, i32
  }
  func.func @transform_4(%arg0: i32, %arg1: i32) -> (i32, i32) {
    %c0_i32 = arith.constant 0 : i32
    %c0_i32_0 = arith.constant 0 : i32
    return %arg0, %c0_i32 : i32, i32
  }
}

</mosaic_0001>

<bundles_post_ra>
// kernel: tpu_custom_call.1
= control target key start
LH: loop header
LB: loop body
LE: loop exit
PB: predicated region body
PF: predicated region fallthrough
CT: control target
= control target key end

     0   :  { %9 = vsyncpa [#allocation4], 0  ;;  %s953_s0 = inlined_call_operand.hbm [shape: f32[8,256], index: 0, kind: input, shape index: {}]   ;;  %s954_s1 = inlined_call_operand.hbm [shape: f32[8,8], index: 1, kind: input, shape index: {}]   ;;  %s955_s2 = inlined_call_operand.hbm [shape: f32[2,8], index: 2, kind: input, shape index: {}]   ;;  %s956_s3 = inlined_call_operand.vmem [shape: f32[1,8], index: 3, kind: input, shape index: {}]   ;;  %s957_s4 = inlined_call_operand.hbm [shape: f32[2,8], index: 4, kind: output, shape index: {}]  }
   0x1   :  { %11 = vsyncpa [#allocation4 + $0x1], 0 }
   0x2   :  { %12 = vsyncpa [#allocation7], 0 }
   0x3   :  { %13 = vsyncpa [#allocation5], 0  ;;  %s830_s15 = smov 0   ;;  %s832_s16 = smov 0  }
   0x4   :  { %s834_s17 = smov 0   ;;  %s836_s18 = smov 0  }
   0x5   :  { %s838_s19 = smov 0   ;;  %s840_s20 = smov 0  }
   0x6 LB: > { %s521_s21 = sadd.s32 4294967295, %s799_s20   ;;  %p53_p0 = scmp.ne.s32.totalorder %s783_s16, %s779_s15  ;;  %s799_s20 = sphi %s840_s20, %s19_s20   ;;  %s795_s19 = sphi %s838_s19, %s966_s19   ;;  %s791_s18 = sphi %s836_s18, %s965_s18   ;;  %s787_s17 = sphi %s834_s17, %s964_s17   ;;  %s783_s16 = sphi %s832_s16, %s963_s16   ;;  %s779_s15 = sphi %s830_s15, %s962_s15  }
   0x7   : > { %p862_p1 = scmp.eq.s32.totalorder %s521_s21, 0  ;;  %p522_p2 = scmp.ge.s32.totalorder %s799_s20, 1 }
   0x8   : > { %p153_p3 = scmp.lt.s32.totalorder %s799_s20, 3  ;;  %s165_s26 = sshll.u32 %s954_s1, 4  ;;  %s166_s26 = int_to_ptr.hbm [resolvable:$true] %s165_s26 }
   0x9   : > { %p870_p4 = por %p862_p1, %p53_p0  ;;  %s801_s28 = smov [#allocation6]  }
   0xa   : > { %p877_p5 = pnand %p522_p2, %p153_p3  ;;  %s167_s29 = sshll.u32 %s801_s28, 4  ;;  %s168_s29 = int_to_ptr.vmem [resolvable:$true] %s167_s29 }
   0xb   : > { %s177_s6 = sshll.u32 %s955_s2, 4  ;;  %s802_s7 = smov [#allocation8]   ;;  %s178_s6 = int_to_ptr.hbm [resolvable:$true] %s177_s6 }
   0xc   : > { %p552_p6 = pneg %p877_p5  ;;  %s179_s8 = sshll.u32 %s802_s7, 4  ;;  %s180_s8 = int_to_ptr.vmem [resolvable:$true] %s179_s8 }
   0xd   : > { %s28_s9 = sadd.s32 1, %s795_s19  ;;  %s40_s10 = sadd.s32 1, %s787_s17 }
   0xe   : > { %p553_p7 = pnand %p552_p6, %p862_p1  ;;  %p29_p8 = scmp.ge.s32.totalorder %s28_s9, 2 }
   0xf   : > { %p47_p9 = scmp.ne.s32.totalorder %s787_s17, %s783_s16  ;;  %p48_p10 = scmp.eq.s32.totalorder %s799_s20, 0 }
  0x10   : > { %555 = dma.hbm_to_vmem [thread:$0]  (!%p553_p7), %s166_s26, 128, %s168_s29, [#allocation7]  }
  0x11   : > { %558 = dma.hbm_to_vmem [thread:$0]  (!%p553_p7), %s178_s6, 32, %s180_s8, [#allocation7]  }
  0x12   : > { %p565_p11 = scmp.lt.s32.totalorder %s799_s20, 2  ;;  %s968_s9 = smov (%p29_p8, %s28_s9), 0 }
  0x13   : > { %p896_p12 = por %p48_p10, %p47_p9  ;;  %s193_s12 = sand.u32 1, %s787_s17  }
  0x14   : > { %s36_s13 = ssub.s32 %s795_s19, %s968_s9  ;;  %s526_s14 = sshll.u32 %s193_s12, 3 }
  0x15   : > { %p38_p13 = scmp.eq.s32.totalorder %s36_s13, 0  ;;  %s527_s15 = sshll.u32 %s795_s19, 3 }
  0x16   : > { %s203_s28 = scalar_lea.hbm %s953_s0, %s527_s15  ;;  %s197_s29 = scalar_lea.vmem [#allocation3], %s526_s14 }
  0x17   : > { %s905_s24 = scalar_select %p38_p13, %s787_s17, %s40_s10  }
  0x18   : > { %s207_s30 = sshll.u32 %s197_s29, 4  ;;  %s205_s5 = sshll.u32 %s203_s28, 4  ;;  %s208_s30 = int_to_ptr.vmem [resolvable:$true] %s207_s30  ;;  %s206_s5 = int_to_ptr.hbm [resolvable:$true] %s205_s5 }
  0x19   : > { %p560_p0 = pnand %p565_p11, %p896_p12  ;;  %s194_s6 = scalar_lea.sflag [#allocation4], %s193_s12 }
  0x1a   : > { %216 = sbr.rel (%p877_p5) target bundleno = 332 (0x14c), region = 36  ;;  %s218_s7 = sand.u32 (!%p877_p5), 1, %s783_s16  }
  0x1b   : > { %562 = dma.hbm_to_vmem [thread:$0]  (!%p560_p0), %s206_s5, 128, %s208_s30, %s194_s6  }
  0x1c   : > { %s529_s8 = sshll.u32 (!%p877_p5), %s218_s7, 3  ;;  %s219_s10 = scalar_lea.sflag (!%p877_p5), [#allocation4], %s218_s7 }
  0x1d   : > { %s222_s13 = scalar_lea.vmem (!%p877_p5), [#allocation3], %s529_s8 }
  0x1f   : > { %766 = dma.done.wait (%p870_p4), %s219_s10, 128  }
  0x20   : > { %768 = vsyncadd (%p870_p4), %s219_s10, 4294967168 }
  0x21   : > { %770 = dma.done.wait (%p862_p1), [#allocation7], 160  }
  0x22   : > { %772 = vsyncadd (%p862_p1), [#allocation7], 4294967136  ;;  %p532_p2 = scmp.ne.s32.totalorder %s791_s18, 0 }
  0x24   : > { %256 = sbr.rel (%p532_p2) target bundleno = 43 (0x2b), region = 52 }
  0x29   : > { %v803_v0 = vmov 0.0  }
  0x2a   : > { %257 = vst [vmem:[#allocation2] sm:$0xff] %v803_v0 }
  0x2b PF: > { %v258_v1 = vld [vmem:[%s222_s13] sm:$0xff]  ;;  %p533_p3 = scmp.ne.s32.totalorder %s791_s18, 1 }
  0x30   : > { %265 = sbr.rel (%p533_p3) target bundleno = 326 (0x146), region = 56 }
  0x31   : > { %v259_v2 = vld [vmem:[#allocation2] sm:$0xff] }
  0x32   : > { %v260_v3 = vadd.f32 %v259_v2, %v258_v1 }
  0x34   : > { %261 = vst [vmem:[#allocation2] sm:$0xff] %v260_v3 }
  0x35   : > { %v271_v5 = vld [vmem:[#allocation8] sm:$0x3]  ;;  %vm276_vm0 = vcmask 64512   ;;  %v269_v10 = vld [vmem:[#allocation6] sm:$0xff]  ;;  %vm426_vm1 = vcmask 58368  }
  0x36   : > { %v278_v6 = vsel %vm276_vm0, %v271_v5, 0  ;;  %v622_v20 = vld [vmem:[%s956_s3] ss:$0 sm:$0xff] }
  0x37   : > { %v297_v7 = vand.u32 4294901760, %v278_v6 }
  0x39   : > { %v298_v8 = vsub.f32 %v278_v6, %v297_v7 }
  0x3b   : > { %v266_v4 = vld [vmem:[#allocation2] sm:$0xff]  ;;  %v299_v9 = vand.u32 4294901760, %v298_v8 }
  0x3c   : > { %267 = vadd.xlane.f32.xlu0 %v266_v4 }
  0x3d   : > { %v300_v11 = vsub.f32 %v298_v8, %v299_v9 }
  0x3f   : > { %v301_v14 = vand.u32 4294901760, %v300_v11 }
  0xaf   : > { %v268_v12 = vpop.xlane.xlu0 %267 }
  0xb0   : > { %v270_v13 = vmul.f32 %v269_v10, %v268_v12 }
  0xb2   : > { %v295_v15 = vand.u32 4294901760, %v270_v13 }
  0xb4   : > { %v322_v16 = vsub.f32 %v270_v13, %v295_v15  ;;  %296 = vmatpush.msra.mxu0 %v295_v15  ;;  %372 = vmatpush.msra.mxu3 %v295_v15 }
  0xb5   : > { %302 = vmatmul.f32.vlgmr.msra.gmra.mxu0 %v301_v14  ;;  %376 = vmatmul.f32.vlgmr.msra.gmra.mxu3 %v299_v9 }
  0xb6   : > { %349 = vmatpush.msra.mxu2 %v322_v16  ;;  %v323_v17 = vand.u32 4294901760, %v322_v16 }
  0xb7   : > { %352 = vmatmul.f32.vlgmr.msra.gmra.mxu2 %v298_v8 }
  0xb8   : > { %398 = vmatpush.msrb.mxu0 %v323_v17  ;;  %v324_v18 = vsub.f32 %v322_v16, %v323_v17 }
  0xba   : > { %v325_v19 = vand.u32 4294901760, %v324_v18 }
  0xbc   : > { %326 = vmatpush.msra.mxu1 %v325_v19 }
  0xbd   : > { %328 = vmatmul.f32.vlgmr.msra.gmra.mxu1 %v297_v7  ;;  %400 = vmatmul.f32.vlgmr.msrb.gmra.mxu0 %v297_v7 }
  0xbe   : > { %420 = vmatpush.msrb.mxu1 %v295_v15 }
  0xc5   : > { %422 = vmatmul.f32.vlgmr.msrb.gmra.mxu1 %v297_v7 }
 0x132   : > { %v303_v21 = vpop.f32.mrf.mxu0 }
 0x133   : > { %v304_v22 = vadd.f32 %v622_v20, %v303_v21 }
 0x138   : > { %v377_v26 = vpop.f32.mrf.mxu3 }
 0x13a   : > { %v329_v23 = vpop.f32.mrf.mxu1  ;;  %v353_v24 = vpop.f32.mrf.mxu2 }
 0x13b   : > { %v330_v25 = vadd.f32 %v329_v23, %v304_v22  ;;  %v401_v28 = vpop.f32.mrf.mxu0 }
 0x13d   : > { %v354_v27 = vadd.f32 %v353_v24, %v330_v25 }
 0x13f   : > { %v378_v29 = vadd.f32 %v377_v26, %v354_v27 }
 0x141   : > { %v402_v30 = vadd.f32 %v401_v28, %v378_v29 }
 0x142   : > { %v423_v31 = vpop.f32.mrf.mxu1 }
 0x143   : > { %v424_v32 = vadd.f32 %v423_v31, %v402_v30 }
 0x145   : > { %427 = vst.msk [vmem:[#allocation9] sm:$0x3] %vm426_vm1, %v424_v32 }
 0x146 PF: > { %p568_p1 = scmp.eq.s32.totalorder %s521_s21, 1  ;;  %s438_s11 = sshll.u32 %s957_s4, 4  ;;  %s439_s11 = int_to_ptr.hbm [resolvable:$true] %s438_s11 }
 0x147   : > { %s804_s12 = smov [#allocation9]  }
 0x148   : > { %s436_s14 = sshll.u32 %s804_s12, 4  ;;  %s437_s14 = int_to_ptr.vmem [resolvable:$true] %s436_s14 }
 0x149   : > { %549 = dma.vmem_to_hbm [thread:$0]  (%p568_p1), %s437_s14, 32, %s439_s11, [#allocation5]  }
 0x14a   : > { %774 = dma.done.wait (%p568_p1), [#allocation5], 32  }
 0x14b   : > { %776 = vsyncadd (%p568_p1), [#allocation5], 4294967264 }
 0x14c PF: > { %s19_s20 = sadd.s32 1, %s799_s20   ;;  %s962_s15 = smov %s783_s16 }
 0x14d   : > { %p16_p4 = scmp.ge.s32.totalorder %s19_s20, 4   ;;  %s963_s16 = smov %s787_s17 }
 0x14e   : > { %s964_s17 = smov %s905_s24  ;;  %s965_s18 = smov %s795_s19 }
 0x14f   : > { %s966_s19 = smov %s968_s9  ;;  %18 = sbr.rel (!%p16_p4) target bundleno = 6 (0x6), region = 90 }
 0x154   :  { %452 = vsyncpa [#allocation4], 1 }
 0x155   :  { %454 = vsyncpa [#allocation4 + $0x1], 1 }
 0x156   :  { %455 = vsyncpa [#allocation7], 1 }
 0x157   :  { %456 = vsyncpa [#allocation5], 1 }
 0x158   :  { %458 = vsyncpa [#allocation5 + $0x1], 1 }

// kernel: tpu_custom_call.1
= control target key start
LH: loop header
LB: loop body
LE: loop exit
PB: predicated region body
PF: predicated region fallthrough
CT: control target
= control target key end

     0   :  { %9 = vsyncpa [#allocation4], 0  ;;  %s828_s0 = inlined_call_operand.hbm [shape: f32[8,256], index: 0, kind: input, shape index: {}]   ;;  %s829_s1 = inlined_call_operand.hbm [shape: f32[8,8], index: 1, kind: input, shape index: {}]   ;;  %s830_s2 = inlined_call_operand.hbm [shape: f32[2,8], index: 2, kind: input, shape index: {}]   ;;  %s831_s3 = inlined_call_operand.vmem [shape: f32[1,8], index: 3, kind: input, shape index: {}]   ;;  %s832_s4 = inlined_call_operand.hbm [shape: f32[2,8], index: 4, kind: output, shape index: {}]  }
   0x1   :  { %11 = vsyncpa [#allocation4 + $0x1], 0 }
   0x2   :  { %12 = vsyncpa [#allocation7], 0 }
   0x3   :  { %13 = vsyncpa [#allocation5], 0  ;;  %s705_s15 = smov 0   ;;  %s707_s16 = smov 0  }
   0x4   :  { %s709_s17 = smov 0   ;;  %s711_s18 = smov 0  }
   0x5   :  { %s713_s19 = smov 0   ;;  %s715_s20 = smov 0  }
   0x6 LB: > { %s395_s21 = sadd.s32 4294967295, %s674_s20   ;;  %p53_p0 = scmp.ne.s32.totalorder %s658_s16, %s654_s15  ;;  %s674_s20 = sphi %s715_s20, %s19_s20   ;;  %s670_s19 = sphi %s713_s19, %s841_s19   ;;  %s666_s18 = sphi %s711_s18, %s840_s18   ;;  %s662_s17 = sphi %s709_s17, %s839_s17   ;;  %s658_s16 = sphi %s707_s16, %s838_s16   ;;  %s654_s15 = sphi %s705_s15, %s837_s15  }
   0x7   : > { %p737_p1 = scmp.eq.s32.totalorder %s395_s21, 0  ;;  %p396_p2 = scmp.ge.s32.totalorder %s674_s20, 1 }
   0x8   : > { %p153_p3 = scmp.lt.s32.totalorder %s674_s20, 3  ;;  %s165_s26 = sshll.u32 %s829_s1, 4  ;;  %s166_s26 = int_to_ptr.hbm [resolvable:$true] %s165_s26 }
   0x9   : > { %p745_p4 = por %p737_p1, %p53_p0  ;;  %s676_s28 = smov [#allocation6]  }
   0xa   : > { %p752_p5 = pnand %p396_p2, %p153_p3  ;;  %s167_s29 = sshll.u32 %s676_s28, 4  ;;  %s168_s29 = int_to_ptr.vmem [resolvable:$true] %s167_s29 }
   0xb   : > { %s177_s6 = sshll.u32 %s830_s2, 4  ;;  %s677_s7 = smov [#allocation8]   ;;  %s178_s6 = int_to_ptr.hbm [resolvable:$true] %s177_s6 }
   0xc   : > { %p427_p6 = pneg %p752_p5  ;;  %s179_s8 = sshll.u32 %s677_s7, 4  ;;  %s180_s8 = int_to_ptr.vmem [resolvable:$true] %s179_s8 }
   0xd   : > { %s28_s9 = sadd.s32 1, %s670_s19  ;;  %s40_s10 = sadd.s32 1, %s662_s17 }
   0xe   : > { %p428_p7 = pnand %p427_p6, %p737_p1  ;;  %p29_p8 = scmp.ge.s32.totalorder %s28_s9, 2 }
   0xf   : > { %p47_p9 = scmp.ne.s32.totalorder %s662_s17, %s658_s16  ;;  %p48_p10 = scmp.eq.s32.totalorder %s674_s20, 0 }
  0x10   : > { %430 = dma.hbm_to_vmem [thread:$0]  (!%p428_p7), %s166_s26, 128, %s168_s29, [#allocation7]  }
  0x11   : > { %433 = dma.hbm_to_vmem [thread:$0]  (!%p428_p7), %s178_s6, 32, %s180_s8, [#allocation7]  }
  0x12   : > { %p440_p11 = scmp.lt.s32.totalorder %s674_s20, 2  ;;  %s843_s9 = smov (%p29_p8, %s28_s9), 0 }
  0x13   : > { %p771_p12 = por %p48_p10, %p47_p9  ;;  %s193_s12 = sand.u32 1, %s662_s17  }
  0x14   : > { %s36_s13 = ssub.s32 %s670_s19, %s843_s9  ;;  %s400_s14 = sshll.u32 %s193_s12, 3 }
  0x15   : > { %p38_p13 = scmp.eq.s32.totalorder %s36_s13, 0  ;;  %s401_s15 = sshll.u32 %s670_s19, 3 }
  0x16   : > { %s203_s28 = scalar_lea.hbm %s828_s0, %s401_s15  ;;  %s197_s29 = scalar_lea.vmem [#allocation3], %s400_s14 }
  0x17   : > { %s780_s24 = scalar_select %p38_p13, %s662_s17, %s40_s10  }
  0x18   : > { %s207_s30 = sshll.u32 %s197_s29, 4  ;;  %s205_s5 = sshll.u32 %s203_s28, 4  ;;  %s208_s30 = int_to_ptr.vmem [resolvable:$true] %s207_s30  ;;  %s206_s5 = int_to_ptr.hbm [resolvable:$true] %s205_s5 }
  0x19   : > { %p435_p0 = pnand %p440_p11, %p771_p12  ;;  %s194_s6 = scalar_lea.sflag [#allocation4], %s193_s12 }
  0x1a   : > { %216 = sbr.rel (%p752_p5) target bundleno = 314 (0x13a), region = 36  ;;  %s218_s7 = sand.u32 (!%p752_p5), 1, %s658_s16  }
  0x1b   : > { %437 = dma.hbm_to_vmem [thread:$0]  (!%p435_p0), %s206_s5, 128, %s208_s30, %s194_s6  }
  0x1c   : > { %s403_s8 = sshll.u32 (!%p752_p5), %s218_s7, 3  ;;  %s219_s10 = scalar_lea.sflag (!%p752_p5), [#allocation4], %s218_s7 }
  0x1d   : > { %s222_s13 = scalar_lea.vmem (!%p752_p5), [#allocation3], %s403_s8 }
  0x1f   : > { %641 = dma.done.wait (%p745_p4), %s219_s10, 128  }
  0x20   : > { %643 = vsyncadd (%p745_p4), %s219_s10, 4294967168 }
  0x21   : > { %645 = dma.done.wait (%p737_p1), [#allocation7], 160  }
  0x22   : > { %647 = vsyncadd (%p737_p1), [#allocation7], 4294967136  ;;  %p406_p2 = scmp.ne.s32.totalorder %s666_s18, 0 }
  0x24   : > { %256 = sbr.rel (%p406_p2) target bundleno = 43 (0x2b), region = 52 }
  0x29   : > { %v678_v0 = vmov 0.0  }
  0x2a   : > { %257 = vst [vmem:[#allocation2] sm:$0xff] %v678_v0 }
  0x2b PF: > { %v258_v1 = vld [vmem:[%s222_s13] sm:$0xff]  ;;  %p407_p3 = scmp.ne.s32.totalorder %s666_s18, 1 }
  0x30   : > { %265 = sbr.rel (%p407_p3) target bundleno = 308 (0x134), region = 56 }
  0x31   : > { %v259_v2 = vld [vmem:[#allocation2] sm:$0xff] }
  0x32   : > { %v260_v3 = vadd.f32 %v259_v2, %v258_v1 }
  0x34   : > { %261 = vst [vmem:[#allocation2] sm:$0xff] %v260_v3 }
  0x35   : > { %v269_v5 = vld [vmem:[#allocation6] sm:$0xff]  ;;  %v271_v8 = vld [vmem:[#allocation8] sm:$0x3]  ;;  %vm276_vm0 = vcmask 64512   ;;  %vm300_vm1 = vcmask 58368  }
  0x36   : > { %v497_v9 = vld [vmem:[%s831_s3] ss:$0 sm:$0xff] }
  0x3b   : > { %v266_v4 = vld [vmem:[#allocation2] sm:$0xff] }
  0x3c   : > { %267 = vadd.xlane.f32.xlu0 %v266_v4 }
  0xaf   : > { %v268_v6 = vpop.xlane.xlu0 %267 }
  0xb0   : > { %v270_v7 = vmul.f32 %v269_v5, %v268_v6 }
  0xb2   : > { %295 = vmatpush.msra.mxu0 %v270_v7 }
  0xb3   : > { %408 = vmatmul.msk.f32.vlgmr.msra.gmra.mxu0 %vm276_vm0, %v271_v8 }
 0x130   : > { %v297_v10 = vpop.f32.mrf.mxu0 }
 0x131   : > { %v298_v11 = vadd.f32 %v497_v9, %v297_v10 }
 0x133   : > { %301 = vst.msk [vmem:[#allocation9] sm:$0x3] %vm300_vm1, %v298_v11 }
 0x134 PF: > { %p443_p1 = scmp.eq.s32.totalorder %s395_s21, 1  ;;  %s312_s11 = sshll.u32 %s832_s4, 4  ;;  %s313_s11 = int_to_ptr.hbm [resolvable:$true] %s312_s11 }
 0x135   : > { %s679_s12 = smov [#allocation9]  }
 0x136   : > { %s310_s14 = sshll.u32 %s679_s12, 4  ;;  %s311_s14 = int_to_ptr.vmem [resolvable:$true] %s310_s14 }
 0x137   : > { %424 = dma.vmem_to_hbm [thread:$0]  (%p443_p1), %s311_s14, 32, %s313_s11, [#allocation5]  }
 0x138   : > { %649 = dma.done.wait (%p443_p1), [#allocation5], 32  }
 0x139   : > { %651 = vsyncadd (%p443_p1), [#allocation5], 4294967264 }
 0x13a PF: > { %s19_s20 = sadd.s32 1, %s674_s20   ;;  %s837_s15 = smov %s658_s16 }
 0x13b   : > { %p16_p4 = scmp.ge.s32.totalorder %s19_s20, 4   ;;  %s838_s16 = smov %s662_s17 }
 0x13c   : > { %s839_s17 = smov %s780_s24  ;;  %s840_s18 = smov %s670_s19 }
 0x13d   : > { %s841_s19 = smov %s843_s9  ;;  %18 = sbr.rel (!%p16_p4) target bundleno = 6 (0x6), region = 90 }
 0x142   :  { %326 = vsyncpa [#allocation4], 1 }
 0x143   :  { %328 = vsyncpa [#allocation4 + $0x1], 1 }
 0x144   :  { %329 = vsyncpa [#allocation7], 1 }
 0x145   :  { %330 = vsyncpa [#allocation5], 1 }
 0x146   :  { %332 = vsyncpa [#allocation5 + $0x1], 1 }

</bundles_post_ra>
